<compile_context>
chip_gen: v7x
topology: tpu7x:2x2x1
jax: 0.10.0
libtpu: 0.0.40
codegen_flags: <defaults>
</compile_context>

<pallas_src>
import functools

import jax
import jax.numpy as jnp
from jax.experimental import pallas as pl
from jax.experimental.pallas import tpu as pltpu


_LANE = 128
_VMEM_LIMIT_BYTES = 48 * 1024 * 1024    # > scoped defaults, < v7x 64 MiB physical
_FUSED_VMEM_BUDGET = 36 * 1024 * 1024   # gate for the A-resident fused path


def _round_up(x, m):
    return ((x + m - 1) // m) * m


def _pick_tile(n_p, candidates, min_tiles=1):
    for t in candidates:
        if n_p % t == 0 and n_p // t >= min_tiles:
            return t
    return _LANE


def _pad2(x, rows, cols, dtype):
    x = x.astype(dtype)
    return jnp.pad(x, ((0, rows - x.shape[0]), (0, cols - x.shape[1])))


# ------------------------ fused two-layer GCN kernel ------------------------
# grid = (layer, row tile), layer outer.  A / X / W / b are VMEM-resident
# (constant index_map -> each is read from HBM exactly once); the bf16 h1
# intermediate lives in a VMEM scratch shared by both layers.
def _fused_gcn_kernel(a_ref, x_ref, w1_ref, b1_ref, w2_ref, b2_ref,
                      o_ref, h1_ref, *, tm):
    layer = pl.program_id(0)
    row0 = pl.multiple_of(pl.program_id(1) * tm, tm)
    a_rows = a_ref[pl.ds(row0, tm), :]                       # (tm, n_p) bf16

    @pl.when(layer == 0)
    def _layer1():
        # relu((A @ X) @ W1 + b1) for this row tile -> resident bf16 h1 scratch.
        ax = jnp.dot(a_rows, x_ref[...], preferred_element_type=jnp.float32)
        h = jnp.dot(ax.astype(w1_ref.dtype), w1_ref[...],
                    preferred_element_type=jnp.float32) + b1_ref[...]
        h1_ref[pl.ds(row0, tm), :] = jnp.maximum(h, 0.0).astype(h1_ref.dtype)
        # Keep the (later overwritten) layer-0 writeback of this block deterministic.
        o_ref[...] = jnp.zeros_like(o_ref)

    @pl.when(layer == 1)
    def _layer2():
        # (A @ h1) @ W2 + b2 for this row tile -> logits.
        ah = jnp.dot(a_rows, h1_ref[...], preferred_element_type=jnp.float32)
        h = jnp.dot(ah.astype(w2_ref.dtype), w2_ref[...],
                    preferred_element_type=jnp.float32) + b2_ref[...]
        o_ref[...] = h.astype(o_ref.dtype)


def _fused_gcn(a_bf, x_bf, w1_bf, b1_f, w2_bf, b2_f, *, tm):
    n_p = a_bf.shape[0]
    f_p = x_bf.shape[1]
    h_p = w1_bf.shape[1]
    c_p = w2_bf.shape[1]

    flops = 2 * n_p * n_p * (f_p + h_p) + 2 * n_p * (f_p * h_p + h_p * c_p)
    bytes_accessed = (a_bf.size * 2 + x_bf.size * 2 + w1_bf.size * 2
                      + w2_bf.size * 2 + b1_f.size * 4 + b2_f.size * 4
                      + n_p * c_p * 4)

    return pl.pallas_call(
        functools.partial(_fused_gcn_kernel, tm=tm),
        out_shape=jax.ShapeDtypeStruct((n_p, c_p), jnp.float32),
        grid_spec=pltpu.PrefetchScalarGridSpec(
            num_scalar_prefetch=0,
            grid=(2, n_p // tm),                              # (layer, row tile)
            in_specs=[
                pl.BlockSpec((n_p, n_p), lambda l, m: (0, 0)),  # A resident: one HBM read
                pl.BlockSpec((n_p, f_p), lambda l, m: (0, 0)),  # X resident
                pl.BlockSpec((f_p, h_p), lambda l, m: (0, 0)),  # W1
                pl.BlockSpec((1, h_p), lambda l, m: (0, 0)),    # b1
                pl.BlockSpec((h_p, c_p), lambda l, m: (0, 0)),  # W2
                pl.BlockSpec((1, c_p), lambda l, m: (0, 0)),    # b2
            ],
            out_specs=pl.BlockSpec((tm, c_p), lambda l, m: (m, 0)),
            scratch_shapes=[pltpu.VMEM((n_p, h_p), jnp.bfloat16)],  # resident h1
        ),
        compiler_params=pltpu.CompilerParams(
            # Layer 2 of any row tile needs layer-1 h1 of ALL row tiles, so both
            # axes stay sequential (no megacore split of the row axis here).
            dimension_semantics=("arbitrary", "arbitrary"),
            vmem_limit_bytes=_VMEM_LIMIT_BYTES),
        cost_estimate=pl.CostEstimate(flops=flops, transcendentals=0,
                                      bytes_accessed=bytes_accessed),
    )(a_bf, x_bf, w1_bf, b1_f, w2_bf, b2_f)


# ------------------- tiled per-layer GraphConv (big graphs) -------------------
# One DGL GraphConv (norm='both') layer:  out = act((A_norm @ X) @ W + b)
# grid = (row tiles m, contraction tiles k); A is streamed, X/W/b resident.
def _graphconv_tiled_kernel(a_ref, x_ref, w_ref, b_ref, o_ref, acc_ref,
                            *, tk, apply_relu):
    k = pl.program_id(1)

    @pl.when(k == 0)
    def _init():
        acc_ref[...] = jnp.zeros_like(acc_ref)

    # Neighbor aggregation: streamed A tile x resident-X slice, f32 MXU acc.
    col0 = pl.multiple_of(k * tk, tk)
    acc_ref[...] += jnp.dot(a_ref[...], x_ref[pl.ds(col0, tk), :],
                            preferred_element_type=jnp.float32)

    @pl.when(k == pl.num_programs(1) - 1)
    def _finalize():
        h = jnp.dot(acc_ref[...].astype(w_ref.dtype), w_ref[...],
                    preferred_element_type=jnp.float32) + b_ref[...]
        if apply_relu:
            h = jnp.maximum(h, 0.0)
        o_ref[...] = h.astype(o_ref.dtype)


def _graphconv_tiled(a_bf, x_bf, w_bf, b_f, *, tm, tk, out_dtype, apply_relu):
    n_p = a_bf.shape[0]
    f_p = x_bf.shape[1]
    o_p = w_bf.shape[1]

    flops = 2 * n_p * n_p * f_p + 2 * n_p * f_p * o_p
    bytes_accessed = (a_bf.size * 2 + x_bf.size * 2 + w_bf.size * 2
                      + b_f.size * 4 + n_p * o_p * jnp.dtype(out_dtype).itemsize)

    return pl.pallas_call(
        functools.partial(_graphconv_tiled_kernel, tk=tk, apply_relu=apply_relu),
        out_shape=jax.ShapeDtypeStruct((n_p, o_p), out_dtype),
        grid_spec=pltpu.PrefetchScalarGridSpec(
            num_scalar_prefetch=0,
            grid=(n_p // tm, n_p // tk),
            in_specs=[
                # A is the dominant HBM stream.
                # TODO(synk): pipeline_mode=pl.Buffered(3) here if a profile
                #             still shows exposed DMA on the contraction axis.
                pl.BlockSpec((tm, tk), lambda m, k: (m, k)),
                pl.BlockSpec((n_p, f_p), lambda m, k: (0, 0)),   # X resident (read once)
                pl.BlockSpec((f_p, o_p), lambda m, k: (0, 0)),   # W resident
                pl.BlockSpec((1, o_p), lambda m, k: (0, 0)),     # bias resident
            ],
            out_specs=pl.BlockSpec((tm, o_p), lambda m, k: (m, 0)),
            scratch_shapes=[pltpu.VMEM((tm, f_p), jnp.float32)],
        ),
        compiler_params=pltpu.CompilerParams(
            dimension_semantics=("parallel", "arbitrary"),
            vmem_limit_bytes=_VMEM_LIMIT_BYTES),
        cost_estimate=pl.CostEstimate(flops=flops, transcendentals=0,
                                      bytes_accessed=bytes_accessed),
    )(a_bf, x_bf, w_bf, b_f)


# --------------------------------- wrapper ---------------------------------
def _fused_vmem_bytes(n_p, f_p, h_p, c_p, tm):
    return (2 * n_p * n_p * 2                       # A (double-buffered) bf16
            + 2 * n_p * f_p * 2                     # X
            + 2 * (f_p * h_p + h_p * c_p) * 2       # W1, W2
            + 2 * (h_p + c_p) * 4                   # biases
            + 2 * tm * c_p * 4                      # output tile
            + n_p * h_p * 2)                        # h1 scratch


@functools.partial(jax.jit, static_argnames=("force_tiled", "tm", "tk"))
def simple_gcn_forward(a_norm, pos, w1, b1, w2, b2, *,
                       force_tiled=False, tm=None, tk=None):
    """Simple_GCN forward.

    Returns (max_nodes_out, h2):
      max_nodes_out : the module's return value, dgl.max_nodes(g, 'pos')   (1, in_feats)
      h2            : the conv2 output (computed by the module, not returned) (N, num_classes)
    """
    n, f_in = pos.shape
    num_classes = w2.shape[1]

    # Pad only to the 128-lane / MXU granularity; tiles are chosen among
    # divisors afterwards (decoupled from padding -> no blow-up for awkward N).
    n_p = _round_up(n, _LANE)
    f_p = _round_up(f_in, _LANE)
    h_p = _round_up(w1.shape[1], _LANE)
    c_p = _round_up(num_classes, _LANE)

    # bf16 matmul operands; zero padding keeps aggregation, bias and slicing
    # exact.  (For repeated calls with a static graph, a_bf could be cached.)
    a_bf = _pad2(a_norm, n_p, n_p, jnp.bfloat16)
    x_bf = _pad2(pos, n_p, f_p, jnp.bfloat16)
    w1_bf = _pad2(w1, f_p, h_p, jnp.bfloat16)
    w2_bf = _pad2(w2, h_p, c_p, jnp.bfloat16)
    b1_f = _pad2(b1.reshape(1, -1), 1, h_p, jnp.float32)
    b2_f = _pad2(b2.reshape(1, -1), 1, c_p, jnp.float32)

    tm_f = tm or _pick_tile(n_p, (512, 256, 128))
    use_fused = (not force_tiled
                 and _fused_vmem_bytes(n_p, f_p, h_p, c_p, tm_f) <= _FUSED_VMEM_BUDGET)

    if use_fused:
        # Single pallas_call: dense normalized adjacency read from HBM once.
        h2 = _fused_gcn(a_bf, x_bf, w1_bf, b1_f, w2_bf, b2_f, tm=tm_f)
    else:
        # Big-graph fallback: per-layer tiled kernels (A streamed, X resident).
        tm_t = tm or _pick_tile(n_p, (512, 256, 128), min_tiles=2)  # >=2 row tiles (v7x megacore)
        tk_t = tk or _pick_tile(n_p, (1024, 512, 256, 128))
        h1 = _graphconv_tiled(a_bf, x_bf, w1_bf, b1_f, tm=tm_t, tk=tk_t,
                              out_dtype=jnp.bfloat16, apply_relu=True)
        h2 = _graphconv_tiled(a_bf, h1, w2_bf, b2_f, tm=tm_t, tk=tk_t,
                              out_dtype=jnp.float32, apply_relu=False)

    # dgl.max_nodes(g, 'pos'): trivial (N x in_feats) column max, done in plain
    # JAX (exact f32) -- the padded side kernel was pure overhead (perf review).
    max_out = jnp.max(pos, axis=0, keepdims=True)

    return max_out, h2[:n, :num_classes]


def build_normalized_adjacency(src, dst, num_nodes):
    """Dense DGL GraphConv (norm='both') normalized adjacency (plain-JAX glue).
    Uses scatter-add so parallel (duplicate) edges are counted like DGL."""
    a = jnp.zeros((num_nodes, num_nodes), jnp.float32)
    a = a.at[src, dst].add(1.0)                     # A[u, v] += 1 per edge u -> v
    out_deg = jnp.clip(a.sum(axis=1), 1.0, None)
    in_deg = jnp.clip(a.sum(axis=0), 1.0, None)
    d_out = out_deg ** -0.5
    d_in = in_deg ** -0.5
    # A_norm[v, u] = d_in[v] * A[u, v] * d_out[u]
    return (d_in[:, None] * a.T) * d_out[None, :]


if __name__ == "__main__":
    IN_FEATS, H_FEATS, NUM_CLASSES = 8, 32, 4

    def xavier(k, fan_in, fan_out):
        limit = (6.0 / (fan_in + fan_out)) ** 0.5
        return jax.random.uniform(k, (fan_in, fan_out), jnp.float32, -limit, limit)

    def matched_reference(a, pos, w1, b1, w2, b2):
        # Numerics-matched reference (bf16 matmul operands, f32 accumulation)
        # mirroring the kernels; a pure-f32 GraphConv differs ~1e-2 relative.
        bf = jnp.bfloat16
        ax = jnp.dot(a.astype(bf), pos.astype(bf), preferred_element_type=jnp.float32)
        h1 = jnp.maximum(
            jnp.dot(ax.astype(bf), w1.astype(bf), preferred_element_type=jnp.float32) + b1,
            0.0).astype(bf)
        ah = jnp.dot(a.astype(bf), h1, preferred_element_type=jnp.float32)
        return jnp.dot(ah.astype(bf), w2.astype(bf), preferred_element_type=jnp.float32) + b2

    key = jax.random.PRNGKey(0)
    k_w1, k_w2, k_pos1, k_pos2 = jax.random.split(key, 4)
    w1 = xavier(k_w1, IN_FEATS, H_FEATS)
    b1 = jnp.zeros((H_FEATS,), jnp.float32)
    w2 = xavier(k_w2, H_FEATS, NUM_CLASSES)
    b2 = jnp.zeros((NUM_CLASSES,), jnp.float32)

    def make_graph(n, k_pos):
        pos = jax.random.normal(k_pos, (n, IN_FEATS), jnp.float32)
        # Deterministic directed graph: ring edges plus "skip-5" edges.
        ring_src = jnp.arange(n, dtype=jnp.int32)
        ring_dst = (ring_src + 1) % n
        extra_src = jnp.arange(0, n, 2, dtype=jnp.int32)
        extra_dst = (extra_src + 5) % n
        src = jnp.concatenate([ring_src, extra_src])
        dst = jnp.concatenate([ring_dst, extra_dst])
        return pos, build_normalized_adjacency(src, dst, n)

    ok = True

    # Small graph -> exercises the A-resident fused path.
    pos_a, adj_a = make_graph(16, k_pos1)
    max_a, h_a = simple_gcn_forward(adj_a, pos_a, w1, b1, w2, b2)
    jax.block_until_ready((max_a, h_a))
    ok &= (h_a.shape == (16, NUM_CLASSES)) and (max_a.shape == (1, IN_FEATS))
    ok &= bool(jnp.allclose(h_a, matched_reference(adj_a, pos_a, w1, b1, w2, b2),
                            atol=2e-2, rtol=2e-2))
    ok &= bool(jnp.allclose(max_a, jnp.max(pos_a, axis=0, keepdims=True)))

    # Mid graph, tiled fallback path forced (multi row / contraction tiles).
    pos_b, adj_b = make_graph(300, k_pos2)
    max_b, h_b = simple_gcn_forward(adj_b, pos_b, w1, b1, w2, b2,
                                    force_tiled=True, tm=128, tk=128)
    jax.block_until_ready((max_b, h_b))
    ok &= (h_b.shape == (300, NUM_CLASSES)) and (max_b.shape == (1, IN_FEATS))
    ok &= bool(jnp.allclose(h_b, matched_reference(adj_b, pos_b, w1, b1, w2, b2),
                            atol=2e-2, rtol=2e-2))
    ok &= bool(jnp.allclose(max_b, jnp.max(pos_b, axis=0, keepdims=True)))

    if not ok:
        raise SystemExit("MISMATCH")
    print("KERNEL_OK")
</pallas_src>

<mosaic_0001>
module attributes {stable_mosaic.version = 11 : i64} {
  func.func @_fused_gcn_kernel(%arg0: i32, %arg1: i32, %arg2: memref<128x128xbf16, #tpu.memory_space<vmem>>, %arg3: memref<128x128xbf16, #tpu.memory_space<vmem>>, %arg4: memref<128x128xbf16, #tpu.memory_space<vmem>>, %arg5: memref<1x128xf32, #tpu.memory_space<vmem>>, %arg6: memref<128x128xbf16, #tpu.memory_space<vmem>>, %arg7: memref<1x128xf32, #tpu.memory_space<vmem>>, %arg8: memref<128x128xf32, #tpu.memory_space<vmem>>, %arg9: memref<128x128xbf16, #tpu.memory_space<vmem>>) attributes {dimension_semantics = [#tpu.dimension_semantics<arbitrary>, #tpu.dimension_semantics<arbitrary>], iteration_bounds = array<i64: 2, 1>, scalar_prefetch = 0 : i64, scratch_operands = 1 : i64, tpu.core_type = #tpu.core_type<tc>, window_params = [{pipeline_mode = #tpu.pipeline_mode<synchronous>, transform_indices = @transform_0, window_bounds = array<i64: 128, 128>}, {pipeline_mode = #tpu.pipeline_mode<synchronous>, transform_indices = @transform_1, window_bounds = array<i64: 128, 128>}, {pipeline_mode = #tpu.pipeline_mode<synchronous>, transform_indices = @transform_2, window_bounds = array<i64: 128, 128>}, {pipeline_mode = #tpu.pipeline_mode<synchronous>, transform_indices = @transform_3, window_bounds = array<i64: 1, 128>}, {pipeline_mode = #tpu.pipeline_mode<synchronous>, transform_indices = @transform_4, window_bounds = array<i64: 128, 128>}, {pipeline_mode = #tpu.pipeline_mode<synchronous>, transform_indices = @transform_5, window_bounds = array<i64: 1, 128>}, {transform_indices = @transform_6, window_bounds = array<i64: 128, 128>}]} {
    %c128_i32 = arith.constant 128 : i32
    %0 = arith.muli %arg1, %c128_i32 : i32
    %1 = tpu.assume_multiple %0, 128 : i32
    %2 = arith.index_cast %1 : i32 to index
    %c0 = arith.constant 0 : index
    %3 = vector.load %arg2[%2, %c0] : memref<128x128xbf16, #tpu.memory_space<vmem>>, vector<128x128xbf16>
    %c0_i32 = arith.constant 0 : i32
    %4 = arith.cmpi eq, %arg0, %c0_i32 : i32
    %5 = arith.extui %4 : i1 to i32
    %c0_i32_0 = arith.constant 0 : i32
    %6 = arith.cmpi ne, %5, %c0_i32_0 : i32
    scf.if %6 {
      %c0_2 = arith.constant 0 : index
      %c0_3 = arith.constant 0 : index
      %10 = vector.load %arg3[%c0_2, %c0_3] : memref<128x128xbf16, #tpu.memory_space<vmem>>, vector<128x128xbf16>
      %cst = arith.constant dense<0.000000e+00> : vector<128x128xf32>
      %11 = tpu.matmul %3, %10, %cst {dimension_numbers = #tpu.dot_dimension_numbers<[1], [0], [0], [1], [0, 0, 1, 1], [], []>} : vector<128x128xbf16>, vector<128x128xbf16>, vector<128x128xf32> -> vector<128x128xf32>
      %12 = arith.truncf %11 : vector<128x128xf32> to vector<128x128xbf16>
      %c0_4 = arith.constant 0 : index
      %c0_5 = arith.constant 0 : index
      %13 = vector.load %arg4[%c0_4, %c0_5] : memref<128x128xbf16, #tpu.memory_space<vmem>>, vector<128x128xbf16>
      %cst_6 = arith.constant dense<0.000000e+00> : vector<128x128xf32>
      %14 = tpu.matmul %12, %13, %cst_6 {dimension_numbers = #tpu.dot_dimension_numbers<[1], [0], [0], [1], [0, 0, 1, 1], [], []>} : vector<128x128xbf16>, vector<128x128xbf16>, vector<128x128xf32> -> vector<128x128xf32>
      %c0_7 = arith.constant 0 : index
      %c0_8 = arith.constant 0 : index
      %15 = vector.load %arg5[%c0_7, %c0_8] : memref<1x128xf32, #tpu.memory_space<vmem>>, vector<1x128xf32>
      %16 = vector.broadcast %15 : vector<1x128xf32> to vector<128x128xf32>
      %17 = arith.addf %14, %16 : vector<128x128xf32>
      %cst_9 = arith.constant 0.000000e+00 : f32
      %18 = vector.broadcast %cst_9 : f32 to vector<128x128xf32>
      %19 = arith.maximumf %17, %18 : vector<128x128xf32>
      %20 = arith.truncf %19 : vector<128x128xf32> to vector<128x128xbf16>
      %21 = arith.index_cast %1 : i32 to index
      %c0_10 = arith.constant 0 : index
      %22 = vector.load %arg9[%21, %c0_10] : memref<128x128xbf16, #tpu.memory_space<vmem>>, vector<128x128xbf16>
      tpu.vector_store %arg9[%21, %c0_10], %20 {strides = array<i32>} : memref<128x128xbf16, #tpu.memory_space<vmem>>, vector<128x128xbf16>,
      %cst_11 = arith.constant 0.000000e+00 : f32
      %23 = vector.broadcast %cst_11 : f32 to vector<128x128xf32>
      %c0_12 = arith.constant 0 : index
      %c0_13 = arith.constant 0 : index
      %24 = vector.load %arg8[%c0_12, %c0_13] : memref<128x128xf32, #tpu.memory_space<vmem>>, vector<128x128xf32>
      tpu.vector_store %arg8[%c0_12, %c0_13], %23 {strides = array<i32>} : memref<128x128xf32, #tpu.memory_space<vmem>>, vector<128x128xf32>,
    } else {
    }
    %c1_i32 = arith.constant 1 : i32
    %7 = arith.cmpi eq, %arg0, %c1_i32 : i32
    %8 = arith.extui %7 : i1 to i32
    %c0_i32_1 = arith.constant 0 : i32
    %9 = arith.cmpi ne, %8, %c0_i32_1 : i32
    scf.if %9 {
      %c0_2 = arith.constant 0 : index
      %c0_3 = arith.constant 0 : index
      %10 = vector.load %arg9[%c0_2, %c0_3] : memref<128x128xbf16, #tpu.memory_space<vmem>>, vector<128x128xbf16>
      %cst = arith.constant dense<0.000000e+00> : vector<128x128xf32>
      %11 = tpu.matmul %3, %10, %cst {dimension_numbers = #tpu.dot_dimension_numbers<[1], [0], [0], [1], [0, 0, 1, 1], [], []>} : vector<128x128xbf16>, vector<128x128xbf16>, vector<128x128xf32> -> vector<128x128xf32>
      %12 = arith.truncf %11 : vector<128x128xf32> to vector<128x128xbf16>
      %c0_4 = arith.constant 0 : index
      %c0_5 = arith.constant 0 : index
      %13 = vector.load %arg6[%c0_4, %c0_5] : memref<128x128xbf16, #tpu.memory_space<vmem>>, vector<128x128xbf16>
      %cst_6 = arith.constant dense<0.000000e+00> : vector<128x128xf32>
      %14 = tpu.matmul %12, %13, %cst_6 {dimension_numbers = #tpu.dot_dimension_numbers<[1], [0], [0], [1], [0, 0, 1, 1], [], []>} : vector<128x128xbf16>, vector<128x128xbf16>, vector<128x128xf32> -> vector<128x128xf32>
      %c0_7 = arith.constant 0 : index
      %c0_8 = arith.constant 0 : index
      %15 = vector.load %arg7[%c0_7, %c0_8] : memref<1x128xf32, #tpu.memory_space<vmem>>, vector<1x128xf32>
      %16 = vector.broadcast %15 : vector<1x128xf32> to vector<128x128xf32>
      %17 = arith.addf %14, %16 : vector<128x128xf32>
      %c0_9 = arith.constant 0 : index
      %c0_10 = arith.constant 0 : index
      %18 = vector.load %arg8[%c0_9, %c0_10] : memref<128x128xf32, #tpu.memory_space<vmem>>, vector<128x128xf32>
      tpu.vector_store %arg8[%c0_9, %c0_10], %17 {strides = array<i32>} : memref<128x128xf32, #tpu.memory_space<vmem>>, vector<128x128xf32>,
    } else {
    }
    return
  }
  func.func @transform_0(%arg0: i32, %arg1: i32) -> (i32, i32) {
    %c0_i32 = arith.constant 0 : i32
    %c0_i32_0 = arith.constant 0 : i32
    %c0_i32_1 = arith.constant 0 : i32
    return %c0_i32, %c0_i32_0 : i32, i32
  }
  func.func @transform_1(%arg0: i32, %arg1: i32) -> (i32, i32) {
    %c0_i32 = arith.constant 0 : i32
    %c0_i32_0 = arith.constant 0 : i32
    %c0_i32_1 = arith.constant 0 : i32
    return %c0_i32, %c0_i32_0 : i32, i32
  }
  func.func @transform_2(%arg0: i32, %arg1: i32) -> (i32, i32) {
    %c0_i32 = arith.constant 0 : i32
    %c0_i32_0 = arith.constant 0 : i32
    %c0_i32_1 = arith.constant 0 : i32
    return %c0_i32, %c0_i32_0 : i32, i32
  }
  func.func @transform_3(%arg0: i32, %arg1: i32) -> (i32, i32) {
    %c0_i32 = arith.constant 0 : i32
    %c0_i32_0 = arith.constant 0 : i32
    %c0_i32_1 = arith.constant 0 : i32
    return %c0_i32, %c0_i32_0 : i32, i32
  }
  func.func @transform_4(%arg0: i32, %arg1: i32) -> (i32, i32) {
    %c0_i32 = arith.constant 0 : i32
    %c0_i32_0 = arith.constant 0 : i32
    %c0_i32_1 = arith.constant 0 : i32
    return %c0_i32, %c0_i32_0 : i32, i32
  }
  func.func @transform_5(%arg0: i32, %arg1: i32) -> (i32, i32) {
    %c0_i32 = arith.constant 0 : i32
    %c0_i32_0 = arith.constant 0 : i32
    %c0_i32_1 = arith.constant 0 : i32
    return %c0_i32, %c0_i32_0 : i32, i32
  }
  func.func @transform_6(%arg0: i32, %arg1: i32) -> (i32, i32) {
    %c0_i32 = arith.constant 0 : i32
    %c0_i32_0 = arith.constant 0 : i32
    return %arg1, %c0_i32 : i32, i32
  }
}

</mosaic_0001>

<bundles_post_ra>
// kernel: simple_gcn_forward.1
= control target key start
LH: loop header
LB: loop body
LE: loop exit
PB: predicated region body
PF: predicated region fallthrough
CT: control target
= control target key end

     0   :  { %s1463_s21 = smov 0   ;;  %s1465_s22 = smov 0   ;;  %s1780_s0 = inlined_call_operand.vmem [shape: bf16[128,128], index: 0, kind: input, shape index: {}]   ;;  %s1781_s1 = inlined_call_operand.vmem [shape: bf16[128,128], index: 1, kind: input, shape index: {}]   ;;  %s1782_s2 = inlined_call_operand.vmem [shape: bf16[128,128], index: 2, kind: input, shape index: {}]   ;;  %s1783_s3 = inlined_call_operand.vmem [shape: f32[1,128], index: 3, kind: input, shape index: {}]   ;;  %s1784_s4 = inlined_call_operand.vmem [shape: bf16[128,128], index: 4, kind: input, shape index: {}]   ;;  %s1785_s5 = inlined_call_operand.vmem [shape: f32[1,128], index: 5, kind: input, shape index: {}]   ;;  %s1786_s6 = inlined_call_operand.vmem [shape: f32[128,128], index: 6, kind: output, shape index: {}]  }
   0x1   :  { %s1467_s23 = smov 0  }
   0x2 LB: > { %s28_s24 = sadd.s32 1, %s1421_s22  ;;  %p1113_p0 = scmp.ge.s32.totalorder %s1425_s23, 1  ;;  %s1425_s23 = sphi %s1467_s23, %s16_s23   ;;  %s1421_s22 = sphi %s1465_s22, %s1788_s22   ;;  %s1417_s21 = sphi %s1463_s21, %s1787_s21  }
   0x3   : > { %p30_p1 = scmp.ge.s32.totalorder %s28_s24, 2  ;;  %p214_p2 = scmp.lt.s32.totalorder %s1425_s23, 3 }
   0x5   : > { %s1790_s24 = smov (%p30_p1, %s28_s24), 0  ;;  %p215_p3 = pnand %p1113_p0, %p214_p2 }
   0x6   : > { %v1486_v0 = vld [vmem:[%s1780_s0] sm:$0xf] (!%p215_p3)  ;;  %v1491_v1 = vld [vmem:[%s1780_s0 + $0x4] sm:$0xf] (!%p215_p3)  ;;  %v1496_v2 = vld [vmem:[%s1780_s0 + $0x8] sm:$0xf] (!%p215_p3) }
   0x7   : > { %218 = sbr.rel (%p215_p3) target bundleno = 1005 (0x3ed), region = 44  ;;  %v1501_v3 = vld [vmem:[%s1780_s0 + $0xc] sm:$0xf] (!%p215_p3)  ;;  %v1506_v4 = vld [vmem:[%s1780_s0 + $0x10] sm:$0xf] (!%p215_p3)  ;;  %p1114_p4 = scmp.ne.s32.totalorder (!%p215_p3), %s1417_s21, 0 }
   0x8   : > { %v1511_v5 = vld [vmem:[%s1780_s0 + $0x14] sm:$0xf] (!%p215_p3)  ;;  %v1516_v6 = vld [vmem:[%s1780_s0 + $0x18] sm:$0xf] (!%p215_p3)  ;;  %v1521_v7 = vld [vmem:[%s1780_s0 + $0x1c] sm:$0xf] (!%p215_p3) }
   0x9   : > { %v1526_v8 = vld [vmem:[%s1780_s0 + $0x20] sm:$0xf] (!%p215_p3)  ;;  %v1531_v9 = vld [vmem:[%s1780_s0 + $0x24] sm:$0xf] (!%p215_p3)  ;;  %v1536_v10 = vld [vmem:[%s1780_s0 + $0x28] sm:$0xf] (!%p215_p3) }
   0xa   : > { %v1541_v11 = vld [vmem:[%s1780_s0 + $0x2c] sm:$0xf] (!%p215_p3)  ;;  %v1546_v12 = vld [vmem:[%s1780_s0 + $0x30] sm:$0xf] (!%p215_p3)  ;;  %v1551_v13 = vld [vmem:[%s1780_s0 + $0x34] sm:$0xf] (!%p215_p3) }
   0xb   : > { %v1556_v14 = vld [vmem:[%s1780_s0 + $0x38] sm:$0xf] (!%p215_p3)  ;;  %v1561_v15 = vld [vmem:[%s1780_s0 + $0x3c] sm:$0xf] (!%p215_p3) }
   0xe   : > { %270 = sbr.rel (%p1114_p4) target bundleno = 511 (0x1ff), region = 48  ;;  %v1379_v16 = vld [vmem:[%s1781_s1] sm:$0xff] (!%p1114_p4)   ;;  %v1115_v17 = vcombine.low (!%p1114_p4), %v1486_v0, %v1491_v1  ;;  %v1380_v18 = vld [vmem:[%s1781_s1 + $0x8] sm:$0xff] (!%p1114_p4)   ;;  %v1381_v19 = vld [vmem:[%s1781_s1 + $0x10] sm:$0xff] (!%p1114_p4)   ;;  %v1116_v32 = vcombine.low (!%p1114_p4), %v1496_v2, %v1501_v3  ;;  %v1117_v33 = vcombine.low (!%p1114_p4), %v1506_v4, %v1511_v5  ;;  %v1118_v34 = vcombine.low (!%p1114_p4), %v1516_v6, %v1521_v7 }
   0xf   : > { %1226 = vmatprep.subr.bf16.mxu0 (!%p1114_p4), %v1379_v16  ;;  %v1382_v20 = vld [vmem:[%s1781_s1 + $0x18] sm:$0xff] (!%p1114_p4)   ;;  %v1387_v21 = vld [vmem:[%s1782_s2] sm:$0xff] (!%p1114_p4)   ;;  %v1388_v22 = vld [vmem:[%s1782_s2 + $0x8] sm:$0xff] (!%p1114_p4)   ;;  %v1119_v35 = vcombine.low (!%p1114_p4), %v1526_v8, %v1531_v9  ;;  %v1120_v36 = vcombine.low (!%p1114_p4), %v1536_v10, %v1541_v11  ;;  %v1121_v37 = vcombine.low (!%p1114_p4), %v1546_v12, %v1551_v13  ;;  %v1122_v38 = vcombine.low (!%p1114_p4), %v1556_v14, %v1561_v15 }
  0x10   : > { %1242 = vmatprep.mubr.bf16.mxu0 (!%p1114_p4), %v1115_v17  ;;  %1227 = vmatpush3.bf16.msra.mxu0 (!%p1114_p4), %v1379_v16  ;;  %v1383_v23 = vld [vmem:[%s1781_s1 + $0x20] sm:$0xff] (!%p1114_p4)   ;;  %v1389_v24 = vld [vmem:[%s1782_s2 + $0x10] sm:$0xff] (!%p1114_p4)   ;;  %v1384_v25 = vld [vmem:[%s1781_s1 + $0x28] sm:$0xff] (!%p1114_p4)   ;;  %v1427_v16 = vmov (!%p1114_p4), 0.0  }
  0x11   : > { %1228 = vmatprep.subr.bf16.mxu0 (!%p1114_p4), %v1380_v18  ;;  %1258 = vmatprep.subr.bf16.mxu1 (!%p1114_p4), %v1387_v21  ;;  %v1390_v26 = vld [vmem:[%s1782_s2 + $0x18] sm:$0xff] (!%p1114_p4)   ;;  %v1385_v27 = vld [vmem:[%s1781_s1 + $0x30] sm:$0xff] (!%p1114_p4)   ;;  %v1391_v28 = vld [vmem:[%s1782_s2 + $0x20] sm:$0xff] (!%p1114_p4)   ;;  %692 = vst [vmem:[%s1786_s6] sm:$0xff] (!%p1114_p4), %v1427_v16 }
  0x12   : > { %1259 = vmatpush3.bf16.msra.mxu1 (!%p1114_p4), %v1387_v21  ;;  %v1386_v29 = vld [vmem:[%s1781_s1 + $0x38] sm:$0xff] (!%p1114_p4)   ;;  %v1392_v30 = vld [vmem:[%s1782_s2 + $0x28] sm:$0xff] (!%p1114_p4)   ;;  %v1393_v31 = vld [vmem:[%s1782_s2 + $0x30] sm:$0xff] (!%p1114_p4)   ;;  %693 = vst [vmem:[%s1786_s6 + $0x8] sm:$0xff] (!%p1114_p4), %v1427_v16 }
  0x13   : > { %1260 = vmatprep.subr.bf16.mxu1 (!%p1114_p4), %v1388_v22  ;;  %v1394_v39 = vld [vmem:[%s1782_s2 + $0x38] sm:$0xff] (!%p1114_p4)   ;;  %694 = vst [vmem:[%s1786_s6 + $0x10] sm:$0xff] (!%p1114_p4), %v1427_v16  ;;  %695 = vst [vmem:[%s1786_s6 + $0x18] sm:$0xff] (!%p1114_p4), %v1427_v16  ;;  %v1131_v17 = vld [vmem:[%s1783_s3] ss:$0 sm:$0xff] (!%p1114_p4) }
  0x14   : > { %1229 = vmatpush3.bf16.msra.mxu0 (!%p1114_p4), %v1380_v18  ;;  %696 = vst [vmem:[%s1786_s6 + $0x20] sm:$0xff] (!%p1114_p4), %v1427_v16  ;;  %697 = vst [vmem:[%s1786_s6 + $0x28] sm:$0xff] (!%p1114_p4), %v1427_v16 }
  0x15   : > { %1230 = vmatprep.subr.bf16.mxu0 %v1381_v19  ;;  %698 = vst [vmem:[%s1786_s6 + $0x30] sm:$0xff] %v1427_v16  ;;  %699 = vst [vmem:[%s1786_s6 + $0x38] sm:$0xff] %v1427_v16 }
  0x16   : > { %1261 = vmatpush3.bf16.msra.mxu1 %v1388_v22  ;;  %700 = vst [vmem:[%s1786_s6 + $0x40] sm:$0xff] %v1427_v16  ;;  %701 = vst [vmem:[%s1786_s6 + $0x48] sm:$0xff] %v1427_v16 }
  0x17   : > { %1262 = vmatprep.subr.bf16.mxu1 %v1389_v24  ;;  %702 = vst [vmem:[%s1786_s6 + $0x50] sm:$0xff] %v1427_v16  ;;  %703 = vst [vmem:[%s1786_s6 + $0x58] sm:$0xff] %v1427_v16 }
  0x18   : > { %1231 = vmatpush3.bf16.msra.mxu0 %v1381_v19  ;;  %704 = vst [vmem:[%s1786_s6 + $0x60] sm:$0xff] %v1427_v16  ;;  %705 = vst [vmem:[%s1786_s6 + $0x68] sm:$0xff] %v1427_v16 }
  0x19   : > { %1232 = vmatprep.subr.bf16.mxu0 %v1382_v20  ;;  %706 = vst [vmem:[%s1786_s6 + $0x70] sm:$0xff] %v1427_v16  ;;  %707 = vst [vmem:[%s1786_s6 + $0x78] sm:$0xff] %v1427_v16 }
  0x1a   : > { %1263 = vmatpush3.bf16.msra.mxu1 %v1389_v24 }
  0x1b   : > { %1264 = vmatprep.subr.bf16.mxu1 %v1390_v26 }
  0x1c   : > { %1233 = vmatpush3.bf16.msra.mxu0 %v1382_v20 }
  0x1d   : > { %1234 = vmatprep.subr.bf16.mxu0 %v1383_v23 }
  0x1e   : > { %1265 = vmatpush3.bf16.msra.mxu1 %v1390_v26 }
  0x1f   : > { %1266 = vmatprep.subr.bf16.mxu1 %v1391_v28 }
  0x20   : > { %1235 = vmatpush3.bf16.msra.mxu0 %v1383_v23 }
  0x21   : > { %1236 = vmatprep.subr.bf16.mxu0 %v1384_v25 }
  0x22   : > { %1267 = vmatpush3.bf16.msra.mxu1 %v1391_v28 }
  0x23   : > { %1268 = vmatprep.subr.bf16.mxu1 %v1392_v30 }
  0x24   : > { %1237 = vmatpush3.bf16.msra.mxu0 %v1384_v25 }
  0x25   : > { %1238 = vmatprep.subr.bf16.mxu0 %v1385_v27 }
  0x26   : > { %1269 = vmatpush3.bf16.msra.mxu1 %v1392_v30 }
  0x27   : > { %1270 = vmatprep.subr.bf16.mxu1 %v1393_v31 }
  0x28   : > { %1239 = vmatpush3.bf16.msra.mxu0 %v1385_v27 }
  0x29   : > { %1240 = vmatprep.subr.bf16.mxu0 %v1386_v29 }
  0x2a   : > { %1271 = vmatpush3.bf16.msra.mxu1 %v1393_v31 }
  0x2b   : > { %1272 = vmatprep.subr.bf16.mxu1 %v1394_v39 }
  0x2c   : > { %1241 = vmatpush3.bf16.msra.mxu0 %v1386_v29 }
  0x2e   : > { %1273 = vmatpush3.bf16.msra.mxu1 %v1394_v39 }
  0x2f   : > { %1243 = vmatmul.mubr.bf16.vlgmr.msra.gmra.mrb[0].mxu0 %v1116_v32 }
  0x30   : > { %1246 = vmatprep.mubr.bf16.mxu0 %v1117_v33 }
  0x37   : > { %1247 = vmatmul.mubr.bf16.gmra.mrb[4].mxu0 %v1118_v34 }
  0x38   : > { %1250 = vmatprep.mubr.bf16.mxu0 %v1119_v35 }
  0x3f   : > { %1251 = vmatmul.mubr.bf16.gmra.mrb[8].mxu0 %v1120_v36 }
  0x40   : > { %1254 = vmatprep.mubr.bf16.mxu0 %v1121_v37 }
  0x47   : > { %1255 = vmatmul.mubr.bf16.gmra.mrb[12].mxu0 %v1122_v38 }
 0x102   : > { %v1244_v40 = vpop.f32.mrb[0].mxu0 }
 0x103   : > { %v417_v41 = vpop.f32.mrb[1].mxu0 }
 0x104   : > { %v1245_v42 = vpop.f32.mrb[2].mxu0 }
 0x105   : > { %v481_v43 = vpack.c.bf16 %v1245_v42, %v1244_v40  ;;  %v420_v44 = vpop.f32.mrb[3].mxu0 }
 0x106   : > { %v480_v45 = vpack.c.bf16 %v420_v44, %v417_v41 }
 0x108   : > { %1274 = vmatprep.mubr.bf16.mxu1 %v480_v45 }
 0x109   : > { %1275 = vmatmul.mubr.bf16.vlgmr.msra.gmra.mrb[0].mxu1 %v481_v43 }
 0x10a   : > { %v1248_v46 = vpop.f32.mrb[4].mxu0 }
 0x10b   : > { %v433_v47 = vpop.f32.mrb[5].mxu0 }
 0x10c   : > { %v1249_v48 = vpop.f32.mrb[6].mxu0 }
 0x10d   : > { %v483_v49 = vpack.c.bf16 %v1249_v48, %v1248_v46  ;;  %v436_v50 = vpop.f32.mrb[7].mxu0 }
 0x10e   : > { %v482_v51 = vpack.c.bf16 %v436_v50, %v433_v47 }
 0x110   : > { %1278 = vmatprep.mubr.bf16.mxu1 %v482_v51 }
 0x111   : > { %1279 = vmatmul.mubr.bf16.gmra.mrb[4].mxu1 %v483_v49 }
 0x112   : > { %v1252_v52 = vpop.f32.mrb[8].mxu0 }
 0x113   : > { %v449_v53 = vpop.f32.mrb[9].mxu0 }
 0x114   : > { %v1253_v54 = vpop.f32.mrb[10].mxu0 }
 0x115   : > { %v485_v55 = vpack.c.bf16 %v1253_v54, %v1252_v52  ;;  %v452_v56 = vpop.f32.mrb[11].mxu0 }
 0x116   : > { %v484_v57 = vpack.c.bf16 %v452_v56, %v449_v53 }
 0x118   : > { %1282 = vmatprep.mubr.bf16.mxu1 %v484_v57 }
 0x119   : > { %1283 = vmatmul.mubr.bf16.gmra.mrb[8].mxu1 %v485_v55 }
 0x11a   : > { %v1256_v58 = vpop.f32.mrb[12].mxu0 }
 0x11b   : > { %v465_v59 = vpop.f32.mrb[13].mxu0 }
 0x11c   : > { %v1257_v60 = vpop.f32.mrb[14].mxu0 }
 0x11d   : > { %v487_v61 = vpack.c.bf16 %v1257_v60, %v1256_v58  ;;  %v468_v62 = vpop.f32.mrb[15].mxu0 }
 0x11e   : > { %v486_v63 = vpack.c.bf16 %v468_v62, %v465_v59 }
 0x120   : > { %1286 = vmatprep.mubr.bf16.mxu1 %v486_v63 }
 0x121   : > { %1287 = vmatmul.mubr.bf16.gmra.mrb[12].mxu1 %v487_v61 }
 0x1dc   : > { %v1276_v18 = vpop.f32.mrb[0].mxu1 }
 0x1dd   : > { %v602_v19 = vadd.f32 %v1276_v18, %v1131_v17  ;;  %v593_v20 = vpop.f32.mrb[1].mxu1 }
 0x1de   : > { %v594_v21 = vadd.f32 %v1131_v17, %v593_v20  ;;  %v1277_v22 = vpop.f32.mrb[2].mxu1 }
 0x1df   : > { %v605_v23 = vadd.f32 %v1277_v22, %v1131_v17  ;;  %v596_v24 = vpop.f32.mrb[3].mxu1  ;;  %v658_v26 = vmax.f32 %v602_v19, 0.0 }
 0x1e0   : > { %v597_v25 = vadd.f32 %v1131_v17, %v596_v24  ;;  %v656_v28 = vmax.f32 %v594_v21, 0.0 }
 0x1e1   : > { %v659_v27 = vmax.f32 %v605_v23, 0.0 }
 0x1e2   : > { %v657_v29 = vmax.f32 %v597_v25, 0.0 }
 0x1e3   : > { %v673_v30 = vpack.c.bf16 %v659_v27, %v658_v26 }
 0x1e4   : > { %v672_v31 = vpack.c.bf16 %v657_v29, %v656_v28  ;;  %v1280_v32 = vpop.f32.mrb[4].mxu1 }
 0x1e5   : > { %685 = vst [vmem:[#allocation2 + $0x8] sm:$0xff] %v673_v30  ;;  %v618_v33 = vadd.f32 %v1280_v32, %v1131_v17  ;;  %v609_v34 = vpop.f32.mrb[5].mxu1 }
 0x1e6   : > { %684 = vst [vmem:[#allocation2] sm:$0xff] %v672_v31  ;;  %v610_v35 = vadd.f32 %v1131_v17, %v609_v34  ;;  %v1281_v36 = vpop.f32.mrb[6].mxu1 }
 0x1e7   : > { %v621_v37 = vadd.f32 %v1281_v36, %v1131_v17  ;;  %v612_v38 = vpop.f32.mrb[7].mxu1  ;;  %v662_v40 = vmax.f32 %v618_v33, 0.0 }
 0x1e8   : > { %v613_v39 = vadd.f32 %v1131_v17, %v612_v38  ;;  %v660_v42 = vmax.f32 %v610_v35, 0.0 }
 0x1e9   : > { %v663_v41 = vmax.f32 %v621_v37, 0.0 }
 0x1ea   : > { %v661_v43 = vmax.f32 %v613_v39, 0.0 }
 0x1eb   : > { %v675_v44 = vpack.c.bf16 %v663_v41, %v662_v40 }
 0x1ec   : > { %v674_v45 = vpack.c.bf16 %v661_v43, %v660_v42  ;;  %v1284_v46 = vpop.f32.mrb[8].mxu1 }
 0x1ed   : > { %687 = vst [vmem:[#allocation2 + $0x18] sm:$0xff] %v675_v44  ;;  %v634_v47 = vadd.f32 %v1284_v46, %v1131_v17  ;;  %v625_v48 = vpop.f32.mrb[9].mxu1 }
 0x1ee   : > { %686 = vst [vmem:[#allocation2 + $0x10] sm:$0xff] %v674_v45  ;;  %v626_v49 = vadd.f32 %v1131_v17, %v625_v48  ;;  %v1285_v50 = vpop.f32.mrb[10].mxu1 }
 0x1ef   : > { %v637_v51 = vadd.f32 %v1285_v50, %v1131_v17  ;;  %v628_v52 = vpop.f32.mrb[11].mxu1  ;;  %v666_v54 = vmax.f32 %v634_v47, 0.0 }
 0x1f0   : > { %v629_v53 = vadd.f32 %v1131_v17, %v628_v52  ;;  %v664_v56 = vmax.f32 %v626_v49, 0.0 }
 0x1f1   : > { %v667_v55 = vmax.f32 %v637_v51, 0.0 }
 0x1f2   : > { %v665_v57 = vmax.f32 %v629_v53, 0.0 }
 0x1f3   : > { %v677_v58 = vpack.c.bf16 %v667_v55, %v666_v54 }
 0x1f4   : > { %v676_v59 = vpack.c.bf16 %v665_v57, %v664_v56  ;;  %v1288_v60 = vpop.f32.mrb[12].mxu1 }
 0x1f5   : > { %689 = vst [vmem:[#allocation2 + $0x28] sm:$0xff] %v677_v58  ;;  %v650_v61 = vadd.f32 %v1288_v60, %v1131_v17  ;;  %v641_v62 = vpop.f32.mrb[13].mxu1 }
 0x1f6   : > { %688 = vst [vmem:[#allocation2 + $0x20] sm:$0xff] %v676_v59  ;;  %v642_v63 = vadd.f32 %v1131_v17, %v641_v62  ;;  %v1289_v16 = vpop.f32.mrb[14].mxu1 }
 0x1f7   : > { %v653_v18 = vadd.f32 %v1289_v16, %v1131_v17  ;;  %v644_v19 = vpop.f32.mrb[15].mxu1  ;;  %v670_v21 = vmax.f32 %v650_v61, 0.0 }
 0x1f8   : > { %v645_v20 = vadd.f32 %v1131_v17, %v644_v19  ;;  %v668_v23 = vmax.f32 %v642_v63, 0.0 }
 0x1f9   : > { %v671_v22 = vmax.f32 %v653_v18, 0.0 }
 0x1fa   : > { %v669_v24 = vmax.f32 %v645_v20, 0.0 }
 0x1fb   : > { %v679_v25 = vpack.c.bf16 %v671_v22, %v670_v21 }
 0x1fc   : > { %v678_v26 = vpack.c.bf16 %v669_v24, %v668_v23 }
 0x1fd   : > { %691 = vst [vmem:[#allocation2 + $0x38] sm:$0xff] %v679_v25 }
 0x1fe   : > { %690 = vst [vmem:[#allocation2 + $0x30] sm:$0xff] %v678_v26 }
 0x1ff PF: > { %p1140_p5 = scmp.ne.s32.totalorder %s1417_s21, 1 }
 0x200   : > { %v712_v27 = vld [vmem:[#allocation2] sm:$0xff] (!%p1140_p5)  ;;  %v713_v28 = vld [vmem:[#allocation2 + $0x8] sm:$0xff] (!%p1140_p5)  ;;  %v1141_v29 = vcombine.low (!%p1140_p5), %v1486_v0, %v1491_v1  ;;  %v714_v17 = vld [vmem:[#allocation2 + $0x10] sm:$0xff] (!%p1140_p5)  ;;  %v1142_v40 = vcombine.low (!%p1140_p5), %v1496_v2, %v1501_v3  ;;  %v1143_v41 = vcombine.low (!%p1140_p5), %v1506_v4, %v1511_v5  ;;  %v1144_v42 = vcombine.low (!%p1140_p5), %v1516_v6, %v1521_v7 }
 0x201   : > { %711 = sbr.rel (%p1140_p5) target bundleno = 1005 (0x3ed), region = 52  ;;  %1290 = vmatprep.subr.bf16.mxu0 (!%p1140_p5), %v712_v27  ;;  %v1395_v30 = vld [vmem:[%s1784_s4] sm:$0xff] (!%p1140_p5)   ;;  %v1396_v31 = vld [vmem:[%s1784_s4 + $0x8] sm:$0xff] (!%p1140_p5)   ;;  %v1397_v0 = vld [vmem:[%s1784_s4 + $0x10] sm:$0xff] (!%p1140_p5)   ;;  %v1145_v43 = vcombine.low (!%p1140_p5), %v1526_v8, %v1531_v9  ;;  %v1146_v44 = vcombine.low (!%p1140_p5), %v1536_v10, %v1541_v11  ;;  %v1147_v2 = vcombine.low (!%p1140_p5), %v1546_v12, %v1551_v13  ;;  %v1148_v3 = vcombine.low (!%p1140_p5), %v1556_v14, %v1561_v15 }
 0x202   : > { %1291 = vmatpush3.bf16.msra.mxu0 (!%p1140_p5), %v712_v27  ;;  %1306 = vmatprep.mubr.bf16.mxu0 (!%p1140_p5), %v1141_v29  ;;  %v715_v1 = vld [vmem:[#allocation2 + $0x18] sm:$0xff] (!%p1140_p5)  ;;  %v716_v33 = vld [vmem:[#allocation2 + $0x20] sm:$0xff] (!%p1140_p5)  ;;  %v717_v35 = vld [vmem:[#allocation2 + $0x28] sm:$0xff] (!%p1140_p5) }
 0x203   : > { %1292 = vmatprep.subr.bf16.mxu0 (!%p1140_p5), %v713_v28  ;;  %1322 = vmatprep.subr.bf16.mxu1 (!%p1140_p5), %v1395_v30  ;;  %v1398_v32 = vld [vmem:[%s1784_s4 + $0x18] sm:$0xff] (!%p1140_p5)   ;;  %v1399_v34 = vld [vmem:[%s1784_s4 + $0x20] sm:$0xff] (!%p1140_p5)   ;;  %v1400_v36 = vld [vmem:[%s1784_s4 + $0x28] sm:$0xff] (!%p1140_p5)  }
 0x204   : > { %1323 = vmatpush3.bf16.msra.mxu1 (!%p1140_p5), %v1395_v30  ;;  %v1401_v38 = vld [vmem:[%s1784_s4 + $0x30] sm:$0xff] (!%p1140_p5)   ;;  %v719_v39 = vld [vmem:[#allocation2 + $0x38] sm:$0xff] (!%p1140_p5)  ;;  %v1149_v58 = vld [vmem:[%s1785_s5] ss:$0 sm:$0xff] (!%p1140_p5) }
 0x205   : > { %1324 = vmatprep.subr.bf16.mxu1 (!%p1140_p5), %v1396_v31  ;;  %v718_v37 = vld [vmem:[#allocation2 + $0x30] sm:$0xff] (!%p1140_p5)  ;;  %v1402_v4 = vld [vmem:[%s1784_s4 + $0x38] sm:$0xff] (!%p1140_p5)  }
 0x206   : > { %1293 = vmatpush3.bf16.msra.mxu0 (!%p1140_p5), %v713_v28 }
 0x207   : > { %1294 = vmatprep.subr.bf16.mxu0 (!%p1140_p5), %v714_v17 }
 0x208   : > { %1325 = vmatpush3.bf16.msra.mxu1 %v1396_v31 }
 0x209   : > { %1326 = vmatprep.subr.bf16.mxu1 %v1397_v0 }
 0x20a   : > { %1295 = vmatpush3.bf16.msra.mxu0 %v714_v17 }
 0x20b   : > { %1296 = vmatprep.subr.bf16.mxu0 %v715_v1 }
 0x20c   : > { %1327 = vmatpush3.bf16.msra.mxu1 %v1397_v0 }
 0x20d   : > { %1328 = vmatprep.subr.bf16.mxu1 %v1398_v32 }
 0x20e   : > { %1297 = vmatpush3.bf16.msra.mxu0 %v715_v1 }
 0x20f   : > { %1298 = vmatprep.subr.bf16.mxu0 %v716_v33 }
 0x210   : > { %1329 = vmatpush3.bf16.msra.mxu1 %v1398_v32 }
 0x211   : > { %1330 = vmatprep.subr.bf16.mxu1 %v1399_v34 }
 0x212   : > { %1299 = vmatpush3.bf16.msra.mxu0 %v716_v33 }
 0x213   : > { %1300 = vmatprep.subr.bf16.mxu0 %v717_v35 }
 0x214   : > { %1331 = vmatpush3.bf16.msra.mxu1 %v1399_v34 }
 0x215   : > { %1332 = vmatprep.subr.bf16.mxu1 %v1400_v36 }
 0x216   : > { %1301 = vmatpush3.bf16.msra.mxu0 %v717_v35 }
 0x217   : > { %1302 = vmatprep.subr.bf16.mxu0 %v718_v37 }
 0x218   : > { %1333 = vmatpush3.bf16.msra.mxu1 %v1400_v36 }
 0x219   : > { %1334 = vmatprep.subr.bf16.mxu1 %v1401_v38 }
 0x21a   : > { %1303 = vmatpush3.bf16.msra.mxu0 %v718_v37 }
 0x21b   : > { %1304 = vmatprep.subr.bf16.mxu0 %v719_v39 }
 0x21c   : > { %1335 = vmatpush3.bf16.msra.mxu1 %v1401_v38 }
 0x21d   : > { %1336 = vmatprep.subr.bf16.mxu1 %v1402_v4 }
 0x21e   : > { %1305 = vmatpush3.bf16.msra.mxu0 %v719_v39 }
 0x220   : > { %1337 = vmatpush3.bf16.msra.mxu1 %v1402_v4 }
 0x221   : > { %1307 = vmatmul.mubr.bf16.vlgmr.msra.gmra.mrb[0].mxu0 %v1142_v40 }
 0x222   : > { %1310 = vmatprep.mubr.bf16.mxu0 %v1143_v41 }
 0x229   : > { %1311 = vmatmul.mubr.bf16.gmra.mrb[4].mxu0 %v1144_v42 }
 0x22a   : > { %1314 = vmatprep.mubr.bf16.mxu0 %v1145_v43 }
 0x231   : > { %1315 = vmatmul.mubr.bf16.gmra.mrb[8].mxu0 %v1146_v44 }
 0x232   : > { %1318 = vmatprep.mubr.bf16.mxu0 %v1147_v2 }
 0x239   : > { %1319 = vmatmul.mubr.bf16.gmra.mrb[12].mxu0 %v1148_v3 }
 0x2f4   : > { %v1308_v5 = vpop.f32.mrb[0].mxu0 }
 0x2f5   : > { %v802_v6 = vpop.f32.mrb[1].mxu0 }
 0x2f6   : > { %v1309_v7 = vpop.f32.mrb[2].mxu0 }
 0x2f7   : > { %v866_v8 = vpack.c.bf16 %v1309_v7, %v1308_v5  ;;  %v805_v9 = vpop.f32.mrb[3].mxu0 }
 0x2f8   : > { %v865_v10 = vpack.c.bf16 %v805_v9, %v802_v6 }
 0x2fa   : > { %1338 = vmatprep.mubr.bf16.mxu1 %v865_v10 }
 0x2fb   : > { %1339 = vmatmul.mubr.bf16.vlgmr.msra.gmra.mrb[0].mxu1 %v866_v8 }
 0x2fc   : > { %v1312_v11 = vpop.f32.mrb[4].mxu0 }
 0x2fd   : > { %v818_v12 = vpop.f32.mrb[5].mxu0 }
 0x2fe   : > { %v1313_v13 = vpop.f32.mrb[6].mxu0 }
 0x2ff   : > { %v868_v45 = vpack.c.bf16 %v1313_v13, %v1312_v11  ;;  %v821_v14 = vpop.f32.mrb[7].mxu0 }
 0x300   : > { %v867_v15 = vpack.c.bf16 %v821_v14, %v818_v12 }
 0x302   : > { %1342 = vmatprep.mubr.bf16.mxu1 %v867_v15 }
 0x303   : > { %1343 = vmatmul.mubr.bf16.gmra.mrb[4].mxu1 %v868_v45 }
 0x304   : > { %v1316_v46 = vpop.f32.mrb[8].mxu0 }
 0x305   : > { %v834_v47 = vpop.f32.mrb[9].mxu0 }
 0x306   : > { %v1317_v48 = vpop.f32.mrb[10].mxu0 }
 0x307   : > { %v870_v49 = vpack.c.bf16 %v1317_v48, %v1316_v46  ;;  %v837_v50 = vpop.f32.mrb[11].mxu0 }
 0x308   : > { %v869_v51 = vpack.c.bf16 %v837_v50, %v834_v47 }
 0x30a   : > { %1346 = vmatprep.mubr.bf16.mxu1 %v869_v51 }
 0x30b   : > { %1347 = vmatmul.mubr.bf16.gmra.mrb[8].mxu1 %v870_v49 }
 0x30c   : > { %v1320_v52 = vpop.f32.mrb[12].mxu0 }
 0x30d   : > { %v850_v53 = vpop.f32.mrb[13].mxu0 }
 0x30e   : > { %v1321_v54 = vpop.f32.mrb[14].mxu0 }
 0x30f   : > { %v872_v55 = vpack.c.bf16 %v1321_v54, %v1320_v52  ;;  %v853_v56 = vpop.f32.mrb[15].mxu0 }
 0x310   : > { %v871_v57 = vpack.c.bf16 %v853_v56, %v850_v53 }
 0x312   : > { %1350 = vmatprep.mubr.bf16.mxu1 %v871_v57 }
 0x313   : > { %1351 = vmatmul.mubr.bf16.gmra.mrb[12].mxu1 %v872_v55 }
 0x3ce   : > { %v1340_v59 = vpop.f32.mrb[0].mxu1 }
 0x3cf   : > { %v987_v60 = vadd.f32 %v1340_v59, %v1149_v58  ;;  %v978_v61 = vpop.f32.mrb[1].mxu1 }
 0x3d0   : > { %v979_v62 = vadd.f32 %v1149_v58, %v978_v61  ;;  %v1341_v63 = vpop.f32.mrb[2].mxu1 }
 0x3d1   : > { %1043 = vst [vmem:[%s1786_s6 + $0x10] sm:$0xff] %v987_v60  ;;  %v990_v16 = vadd.f32 %v1341_v63, %v1149_v58  ;;  %v981_v18 = vpop.f32.mrb[3].mxu1 }
 0x3d2   : > { %1041 = vst [vmem:[%s1786_s6] sm:$0xff] %v979_v62  ;;  %v982_v19 = vadd.f32 %v1149_v58, %v981_v18 }
 0x3d3   : > { %1044 = vst [vmem:[%s1786_s6 + $0x18] sm:$0xff] %v990_v16 }
 0x3d4   : > { %1042 = vst [vmem:[%s1786_s6 + $0x8] sm:$0xff] %v982_v19 }
 0x3d6   : > { %v1344_v20 = vpop.f32.mrb[4].mxu1 }
 0x3d7   : > { %v1003_v21 = vadd.f32 %v1344_v20, %v1149_v58  ;;  %v994_v22 = vpop.f32.mrb[5].mxu1 }
 0x3d8   : > { %v995_v23 = vadd.f32 %v1149_v58, %v994_v22  ;;  %v1345_v24 = vpop.f32.mrb[6].mxu1 }
 0x3d9   : > { %1047 = vst [vmem:[%s1786_s6 + $0x30] sm:$0xff] %v1003_v21  ;;  %v1006_v25 = vadd.f32 %v1345_v24, %v1149_v58  ;;  %v997_v26 = vpop.f32.mrb[7].mxu1 }
 0x3da   : > { %1045 = vst [vmem:[%s1786_s6 + $0x20] sm:$0xff] %v995_v23  ;;  %v998_v27 = vadd.f32 %v1149_v58, %v997_v26 }
 0x3db   : > { %1048 = vst [vmem:[%s1786_s6 + $0x38] sm:$0xff] %v1006_v25 }
 0x3dc   : > { %1046 = vst [vmem:[%s1786_s6 + $0x28] sm:$0xff] %v998_v27 }
 0x3de   : > { %v1348_v28 = vpop.f32.mrb[8].mxu1 }
 0x3df   : > { %v1019_v29 = vadd.f32 %v1348_v28, %v1149_v58  ;;  %v1010_v17 = vpop.f32.mrb[9].mxu1 }
 0x3e0   : > { %v1011_v30 = vadd.f32 %v1149_v58, %v1010_v17  ;;  %v1349_v31 = vpop.f32.mrb[10].mxu1 }
 0x3e1   : > { %1051 = vst [vmem:[%s1786_s6 + $0x50] sm:$0xff] %v1019_v29  ;;  %v1022_v0 = vadd.f32 %v1349_v31, %v1149_v58  ;;  %v1013_v1 = vpop.f32.mrb[11].mxu1 }
 0x3e2   : > { %1049 = vst [vmem:[%s1786_s6 + $0x40] sm:$0xff] %v1011_v30  ;;  %v1014_v32 = vadd.f32 %v1149_v58, %v1013_v1 }
 0x3e3   : > { %1052 = vst [vmem:[%s1786_s6 + $0x58] sm:$0xff] %v1022_v0 }
 0x3e4   : > { %1050 = vst [vmem:[%s1786_s6 + $0x48] sm:$0xff] %v1014_v32 }
 0x3e6   : > { %v1352_v33 = vpop.f32.mrb[12].mxu1 }
 0x3e7   : > { %v1035_v34 = vadd.f32 %v1352_v33, %v1149_v58  ;;  %v1026_v35 = vpop.f32.mrb[13].mxu1 }
 0x3e8   : > { %v1027_v36 = vadd.f32 %v1149_v58, %v1026_v35  ;;  %v1353_v37 = vpop.f32.mrb[14].mxu1 }
 0x3e9   : > { %1055 = vst [vmem:[%s1786_s6 + $0x70] sm:$0xff] %v1035_v34  ;;  %v1038_v38 = vadd.f32 %v1353_v37, %v1149_v58  ;;  %v1029_v39 = vpop.f32.mrb[15].mxu1 }
 0x3ea   : > { %1053 = vst [vmem:[%s1786_s6 + $0x60] sm:$0xff] %v1027_v36  ;;  %v1030_v40 = vadd.f32 %v1149_v58, %v1029_v39 }
 0x3eb   : > { %1056 = vst [vmem:[%s1786_s6 + $0x78] sm:$0xff] %v1038_v38 }
 0x3ec   : > { %1054 = vst [vmem:[%s1786_s6 + $0x68] sm:$0xff] %v1030_v40 }
 0x3ed PF: > { %s16_s23 = sadd.s32 1, %s1425_s23   ;;  %s1787_s21 = smov %s1421_s22 }
 0x3ee   : > { %p13_p6 = scmp.ge.s32.totalorder %s16_s23, 4   ;;  %s1788_s22 = smov %s1790_s24 }
 0x3f0   :  { %15 = sbr.rel (!%p13_p6) target bundleno = 2 (0x2), region = 81 }

</bundles_post_ra>
